<compile_context>
chip_gen: v7x
topology: tpu7x:2x2x1
jax: 0.10.0
libtpu: 0.0.40
codegen_flags: <defaults>
</compile_context>

<pallas_src>
import math
import functools

import jax
import jax.numpy as jnp
from jax.experimental import pallas as pl
from jax.experimental.pallas import tpu as pltpu  # noqa: F401

# ---------------- model config (small, consistent with the module) -----------
D_MODEL = 32
NHEAD = 4
DIM_FF = 64
SEQ = 8
BATCH = 2
LN_EPS = 1e-5
HEAD_DIM = D_MODEL // NHEAD


def _align128(n):
    return ((n + 127) // 128) * 128


# Weight-slab column layout: every segment starts on a 128-lane boundary so the
# static in-kernel slices never need lane rotates.
COL_QKV = 0                                   # (D, 3D)
COL_WO = _align128(COL_QKV + 3 * D_MODEL)     # 128   (D, D)
COL_W1 = _align128(COL_WO + D_MODEL)          # 256   (D, F)
COL_W2 = _align128(COL_W1 + DIM_FF)           # 384   (F, D)
W_COLS = _align128(COL_W2 + D_MODEL)          # 512
W_ROWS = max(D_MODEL, DIM_FF)                 # 64

# Bias/LayerNorm slab row layout -- exactly one (8, 128) f32 tile.
ROW_BQKV, ROW_BO, ROW_B1, ROW_B2, ROW_G1, ROW_BE1, ROW_G2, ROW_BE2 = range(8)
B_COLS = 128


def _encoder_layer_kernel(
    x_ref,        # (B*S, D)  token rows, s-major / b-minor ordering (f32)
    w_ref,        # (W_ROWS, W_COLS) bf16 packed weights [wqkv | wo | w1 | w2]
    b_ref,        # (8, 128)  f32 packed biases + LN params
    o_ref,        # (B*S, D)
    *, n_batch, nhead, dim_ff,
):
    n_tok, d = x_ref.shape
    head_dim = d // nhead

    x = x_ref[...].astype(jnp.float32)                 # residual path stays f32
    xb = x.astype(jnp.bfloat16)                        # MXU operand

    # ---- fused QKV projection over all B*S rows (one MXU push) --------------
    qkv = jnp.dot(xb, w_ref[0:d, COL_QKV:COL_QKV + 3 * d],
                  preferred_element_type=jnp.float32) \
        + b_ref[ROW_BQKV:ROW_BQKV + 1, 0:3 * d]
    q = qkv[:, 0:d]
    k = qkv[:, d:2 * d]
    v = qkv[:, 2 * d:3 * d]

    # ---- same-batch mask (token row t belongs to batch t % n_batch) ---------
    if (n_batch & (n_batch - 1)) == 0:                 # power of two: cheap AND
        row_b = jax.lax.broadcasted_iota(jnp.int32, (n_tok, 1), 0) & (n_batch - 1)
        col_b = jax.lax.broadcasted_iota(jnp.int32, (1, n_tok), 1) & (n_batch - 1)
    else:
        row_b = jax.lax.broadcasted_iota(jnp.int32, (n_tok, 1), 0) % n_batch
        col_b = jax.lax.broadcasted_iota(jnp.int32, (1, n_tok), 1) % n_batch
    same_batch = row_b == col_b                        # (N, N) via broadcast

    # ---- multi-head self attention; head outputs stay register-resident -----
    scale = 1.0 / math.sqrt(head_dim)
    heads = []
    for h in range(nhead):                             # static unroll, nhead small
        sl = slice(h * head_dim, (h + 1) * head_dim)
        qh, kh, vh = q[:, sl], k[:, sl], v[:, sl]      # (N, Dh) f32
        s = jax.lax.dot_general(                       # q @ k^T, scores in f32
            qh, kh, (((1,), (1,)), ((), ())),
            preferred_element_type=jnp.float32) * scale
        s = jnp.where(same_batch, s, -1e30)            # block cross-batch attention
        s = s - jnp.max(s, axis=-1, keepdims=True)
        p = jnp.exp(s)
        p = p / jnp.sum(p, axis=-1, keepdims=True)     # exact divide (cheap at N=16)
        heads.append(jnp.dot(p.astype(jnp.bfloat16), vh.astype(jnp.bfloat16),
                             preferred_element_type=jnp.float32))
    attn = jnp.concatenate(heads, axis=-1)             # (N, D) f32, no VMEM round-trip

    attn = jnp.dot(attn.astype(jnp.bfloat16), w_ref[0:d, COL_WO:COL_WO + d],
                   preferred_element_type=jnp.float32) \
        + b_ref[ROW_BO:ROW_BO + 1, 0:d]

    # ---- residual + layernorm (f32 elementwise everywhere) ------------------
    def layer_norm(y, g, b):
        mu = jnp.mean(y, axis=-1, keepdims=True)
        var = jnp.mean((y - mu) * (y - mu), axis=-1, keepdims=True)
        return (y - mu) * jax.lax.rsqrt(var + LN_EPS) * g + b

    y = layer_norm(x + attn,
                   b_ref[ROW_G1:ROW_G1 + 1, 0:d], b_ref[ROW_BE1:ROW_BE1 + 1, 0:d])

    # ---- feed-forward --------------------------------------------------------
    h1 = jnp.dot(y.astype(jnp.bfloat16), w_ref[0:d, COL_W1:COL_W1 + dim_ff],
                 preferred_element_type=jnp.float32) \
        + b_ref[ROW_B1:ROW_B1 + 1, 0:dim_ff]
    h1 = jnp.maximum(h1, 0.0)                          # ReLU
    h2 = jnp.dot(h1.astype(jnp.bfloat16), w_ref[0:dim_ff, COL_W2:COL_W2 + d],
                 preferred_element_type=jnp.float32) \
        + b_ref[ROW_B2:ROW_B2 + 1, 0:d]

    out = layer_norm(y + h2,
                     b_ref[ROW_G2:ROW_G2 + 1, 0:d], b_ref[ROW_BE2:ROW_BE2 + 1, 0:d])
    # Output stays in the natural (B*S, D) layout; a (4,128) relayout would cost
    # more XLU shuffle than the few masked stores it saves at this size.
    o_ref[...] = out.astype(o_ref.dtype)


def transformer_encoder_layer(x_sbd, params):
    """x_sbd: (seq, batch, d_model), batch_first=False. Single fused kernel call."""
    S, B, D = x_sbd.shape
    n_tok = S * B
    x_flat = x_sbd.reshape(n_tok, D)                   # free row-major reshape

    kernel = functools.partial(_encoder_layer_kernel,
                               n_batch=B, nhead=NHEAD, dim_ff=DIM_FF)
    # TODO(synk): when this layer is stacked or the token count grows, add a
    # query-row-tile grid (dimension_semantics=("parallel",...) for v7x's 2 TCs)
    # and a flash-style streaming softmax; at N = B*S = 16 a single grid-less
    # call is already launch/DMA-overhead-bound, so no grid is used here.
    out = pl.pallas_call(
        kernel,
        out_shape=jax.ShapeDtypeStruct((n_tok, D), x_sbd.dtype),
    )(x_flat, params["w_slab"], params["b_slab"])

    return out.reshape(S, B, D)                        # free reshape back


# ---------------- deterministic parameter construction -----------------------
def make_params(key, d_model=D_MODEL, dim_ff=DIM_FF):
    keys = jax.random.split(key, 12)
    scale = 0.05

    def nrm(k, shape):
        return (scale * jax.random.normal(k, shape)).astype(jnp.float32)

    # PyTorch linear computes x @ W^T; store already-transposed matrices so the
    # kernel does x @ W directly.  in_proj is fused: columns [q | k | v].
    in_proj_w = nrm(keys[0], (3 * d_model, d_model))   # PyTorch layout (3D, D)
    in_proj_b = nrm(keys[1], (3 * d_model,))
    wo = nrm(keys[2], (d_model, d_model)).T            # (D, D)
    bo = nrm(keys[3], (d_model,))
    w1 = nrm(keys[4], (dim_ff, d_model)).T             # (D, F)
    b1 = nrm(keys[5], (dim_ff,))
    w2 = nrm(keys[6], (d_model, dim_ff)).T             # (F, D)
    b2 = nrm(keys[7], (d_model,))
    g1 = (1.0 + 0.1 * jax.random.normal(keys[8], (d_model,))).astype(jnp.float32)
    be1 = (0.05 * jax.random.normal(keys[9], (d_model,))).astype(jnp.float32)
    g2 = (1.0 + 0.1 * jax.random.normal(keys[10], (d_model,))).astype(jnp.float32)
    be2 = (0.05 * jax.random.normal(keys[11], (d_model,))).astype(jnp.float32)

    w_qkv = in_proj_w.T                                # (D, 3D)

    # ---- pack into two lane-dense slabs (3 input DMAs total for the kernel) --
    w_slab = jnp.zeros((W_ROWS, W_COLS), jnp.float32)
    w_slab = w_slab.at[:d_model, COL_QKV:COL_QKV + 3 * d_model].set(w_qkv)
    w_slab = w_slab.at[:d_model, COL_WO:COL_WO + d_model].set(wo)
    w_slab = w_slab.at[:d_model, COL_W1:COL_W1 + dim_ff].set(w1)
    w_slab = w_slab.at[:dim_ff, COL_W2:COL_W2 + d_model].set(w2)
    w_slab = w_slab.astype(jnp.bfloat16)               # MXU is bf16-native

    b_slab = jnp.zeros((8, B_COLS), jnp.float32)
    b_slab = b_slab.at[ROW_BQKV, :3 * d_model].set(in_proj_b)
    b_slab = b_slab.at[ROW_BO, :d_model].set(bo)
    b_slab = b_slab.at[ROW_B1, :dim_ff].set(b1)
    b_slab = b_slab.at[ROW_B2, :d_model].set(b2)
    b_slab = b_slab.at[ROW_G1, :d_model].set(g1)
    b_slab = b_slab.at[ROW_BE1, :d_model].set(be1)
    b_slab = b_slab.at[ROW_G2, :d_model].set(g2)
    b_slab = b_slab.at[ROW_BE2, :d_model].set(be2)

    return {
        # packed kernel operands
        "w_slab": w_slab, "b_slab": b_slab,
        # unpacked f32 copies for the pure-JAX reference
        "w_qkv": w_qkv, "b_qkv": in_proj_b.reshape(1, 3 * d_model),
        "wo": wo, "bo": bo.reshape(1, d_model),
        "w1": w1, "b1": b1.reshape(1, dim_ff),
        "w2": w2, "b2": b2.reshape(1, d_model),
        "ln": jnp.stack([g1, be1, g2, be2]),            # (4, D)
    }


# ---------------- pure-JAX f32 reference (for correctness check) -------------
def reference(x_sbd, p):
    x = jnp.transpose(x_sbd, (1, 0, 2)).astype(jnp.float32)   # (B, S, D)
    B, S, D = x.shape
    qkv = x @ p["w_qkv"] + p["b_qkv"]
    q, k, v = qkv[..., :D], qkv[..., D:2 * D], qkv[..., 2 * D:]

    def split(t):
        return t.reshape(B, S, NHEAD, HEAD_DIM).transpose(0, 2, 1, 3)

    qh, kh, vh = split(q), split(k), split(v)
    s = jnp.einsum("bhqd,bhkd->bhqk", qh, kh) / math.sqrt(HEAD_DIM)
    a = jax.nn.softmax(s, axis=-1)
    o = jnp.einsum("bhqk,bhkd->bhqd", a, vh).transpose(0, 2, 1, 3).reshape(B, S, D)
    o = o @ p["wo"] + p["bo"]

    def ln(y, g, b):
        mu = jnp.mean(y, -1, keepdims=True)
        var = jnp.mean((y - mu) ** 2, -1, keepdims=True)
        return (y - mu) * jax.lax.rsqrt(var + LN_EPS) * g + b

    g1, be1, g2, be2 = p["ln"][0], p["ln"][1], p["ln"][2], p["ln"][3]
    y = ln(x + o, g1, be1)
    h = jnp.maximum(y @ p["w1"] + p["b1"], 0.0) @ p["w2"] + p["b2"]
    out = ln(y + h, g2, be2)
    return out.transpose(1, 0, 2)                       # (S, B, D)


if __name__ == "__main__":
    key = jax.random.PRNGKey(0)
    kx, kp = jax.random.split(key)
    x = jax.random.normal(kx, (SEQ, BATCH, D_MODEL), dtype=jnp.float32)
    params = make_params(kp)

    out = transformer_encoder_layer(x, params)
    out = jax.block_until_ready(out)

    ref = reference(x, params)
    assert out.shape == (SEQ, BATCH, D_MODEL), out.shape
    assert bool(jnp.all(jnp.isfinite(out)))
    err = float(jnp.max(jnp.abs(out - ref)))
    # bf16 MXU operands vs the all-f32 reference bound parity at the ~1e-2
    # level at these magnitudes (softmax uses an exact divide; accumulation,
    # softmax and LayerNorm are f32).  3e-2 leaves headroom above that.
    assert err < 3e-2, err
    print("KERNEL_OK")
</pallas_src>

<mosaic_0001>
module attributes {stable_mosaic.version = 11 : i64} {
  func.func @_encoder_layer_kernel(%arg0: memref<16x32xf32, #tpu.memory_space<vmem>>, %arg1: memref<64x512xbf16, #tpu.memory_space<vmem>>, %arg2: memref<8x128xf32, #tpu.memory_space<vmem>>, %arg3: memref<16x32xf32, #tpu.memory_space<vmem>>) attributes {dimension_semantics = [], scalar_prefetch = 0 : i64, scratch_operands = 0 : i64, tpu.core_type = #tpu.core_type<tc>} {
    %c0 = arith.constant 0 : index
    %c0_0 = arith.constant 0 : index
    %0 = vector.load %arg0[%c0, %c0_0] : memref<16x32xf32, #tpu.memory_space<vmem>>, vector<16x32xf32>
    %1 = arith.truncf %0 : vector<16x32xf32> to vector<16x32xbf16>
    %c0_1 = arith.constant 0 : index
    %c0_2 = arith.constant 0 : index
    %2 = vector.load %arg1[%c0_1, %c0_2] : memref<64x512xbf16, #tpu.memory_space<vmem>>, vector<32x96xbf16>
    %cst = arith.constant dense<0.000000e+00> : vector<16x96xf32>
    %3 = tpu.matmul %1, %2, %cst {dimension_numbers = #tpu.dot_dimension_numbers<[1], [0], [0], [1], [0, 0, 1, 1], [], []>} : vector<16x32xbf16>, vector<32x96xbf16>, vector<16x96xf32> -> vector<16x96xf32>
    %c0_3 = arith.constant 0 : index
    %c0_4 = arith.constant 0 : index
    %4 = vector.load %arg2[%c0_3, %c0_4] : memref<8x128xf32, #tpu.memory_space<vmem>>, vector<1x96xf32>
    %5 = vector.broadcast %4 : vector<1x96xf32> to vector<16x96xf32>
    %6 = arith.addf %3, %5 : vector<16x96xf32>
    %7 = vector.extract_strided_slice %6 {offsets = [0, 0], sizes = [16, 32], strides = [1, 1]} : vector<16x96xf32> to vector<16x32xf32>
    %8 = vector.extract_strided_slice %6 {offsets = [0, 32], sizes = [16, 32], strides = [1, 1]} : vector<16x96xf32> to vector<16x32xf32>
    %9 = vector.extract_strided_slice %6 {offsets = [0, 64], sizes = [16, 32], strides = [1, 1]} : vector<16x96xf32> to vector<16x32xf32>
    %10 = tpu.iota {dimensions = array<i32: 0>} : vector<16x1xi32>
    %c1_i32 = arith.constant 1 : i32
    %11 = vector.broadcast %c1_i32 : i32 to vector<16x1xi32>
    %12 = arith.andi %10, %11 : vector<16x1xi32>
    %13 = tpu.iota {dimensions = array<i32: 1>} : vector<1x16xi32>
    %c1_i32_5 = arith.constant 1 : i32
    %14 = vector.broadcast %c1_i32_5 : i32 to vector<1x16xi32>
    %15 = arith.andi %13, %14 : vector<1x16xi32>
    %16 = vector.broadcast %12 : vector<16x1xi32> to vector<16x16xi32>
    %17 = vector.broadcast %15 : vector<1x16xi32> to vector<16x16xi32>
    %18 = arith.cmpi eq, %16, %17 : vector<16x16xi32>
    %19 = vector.extract_strided_slice %7 {offsets = [0, 0], sizes = [16, 8], strides = [1, 1]} : vector<16x32xf32> to vector<16x8xf32>
    %20 = vector.extract_strided_slice %8 {offsets = [0, 0], sizes = [16, 8], strides = [1, 1]} : vector<16x32xf32> to vector<16x8xf32>
    %21 = vector.extract_strided_slice %9 {offsets = [0, 0], sizes = [16, 8], strides = [1, 1]} : vector<16x32xf32> to vector<16x8xf32>
    %cst_6 = arith.constant dense<0.000000e+00> : vector<16x16xf32>
    %22 = tpu.matmul %19, %20, %cst_6 {dimension_numbers = #tpu.dot_dimension_numbers<[1], [1], [0], [0], [0, 0, 1, 0], [], []>} : vector<16x8xf32>, vector<16x8xf32>, vector<16x16xf32> -> vector<16x16xf32>
    %cst_7 = arith.constant 0.353553385 : f32
    %23 = vector.broadcast %cst_7 : f32 to vector<16x16xf32>
    %24 = arith.mulf %22, %23 : vector<16x16xf32>
    %cst_8 = arith.constant -1.000000e+30 : f32
    %25 = vector.broadcast %cst_8 : f32 to vector<16x16xf32>
    %26 = arith.select %18, %24, %25 : vector<16x16xi1>, vector<16x16xf32>
    %cst_9 = arith.constant dense<0xFF800000> : vector<16xf32>
    %27 = vector.multi_reduction <maximumf>, %26, %cst_9 [1] : vector<16x16xf32> to vector<16xf32>
    %28 = vector.shape_cast %27 : vector<16xf32> to vector<16x1xf32>
    %29 = vector.broadcast %28 : vector<16x1xf32> to vector<16x16xf32>
    %30 = arith.subf %26, %29 : vector<16x16xf32>
    %31 = math.exp %30 : vector<16x16xf32>
    %cst_10 = arith.constant dense<0.000000e+00> : vector<16xf32>
    %32 = vector.multi_reduction <add>, %31, %cst_10 [1] : vector<16x16xf32> to vector<16xf32>
    %33 = vector.shape_cast %32 : vector<16xf32> to vector<16x1xf32>
    %34 = vector.broadcast %33 : vector<16x1xf32> to vector<16x16xf32>
    %35 = arith.divf %31, %34 : vector<16x16xf32>
    %36 = arith.truncf %35 : vector<16x16xf32> to vector<16x16xbf16>
    %37 = arith.truncf %21 : vector<16x8xf32> to vector<16x8xbf16>
    %cst_11 = arith.constant dense<0.000000e+00> : vector<16x8xf32>
    %38 = tpu.matmul %36, %37, %cst_11 {dimension_numbers = #tpu.dot_dimension_numbers<[1], [0], [0], [1], [0, 0, 1, 1], [], []>} : vector<16x16xbf16>, vector<16x8xbf16>, vector<16x8xf32> -> vector<16x8xf32>
    %39 = vector.extract_strided_slice %7 {offsets = [0, 8], sizes = [16, 8], strides = [1, 1]} : vector<16x32xf32> to vector<16x8xf32>
    %40 = vector.extract_strided_slice %8 {offsets = [0, 8], sizes = [16, 8], strides = [1, 1]} : vector<16x32xf32> to vector<16x8xf32>
    %41 = vector.extract_strided_slice %9 {offsets = [0, 8], sizes = [16, 8], strides = [1, 1]} : vector<16x32xf32> to vector<16x8xf32>
    %cst_12 = arith.constant dense<0.000000e+00> : vector<16x16xf32>
    %42 = tpu.matmul %39, %40, %cst_12 {dimension_numbers = #tpu.dot_dimension_numbers<[1], [1], [0], [0], [0, 0, 1, 0], [], []>} : vector<16x8xf32>, vector<16x8xf32>, vector<16x16xf32> -> vector<16x16xf32>
    %cst_13 = arith.constant 0.353553385 : f32
    %43 = vector.broadcast %cst_13 : f32 to vector<16x16xf32>
    %44 = arith.mulf %42, %43 : vector<16x16xf32>
    %cst_14 = arith.constant -1.000000e+30 : f32
    %45 = vector.broadcast %cst_14 : f32 to vector<16x16xf32>
    %46 = arith.select %18, %44, %45 : vector<16x16xi1>, vector<16x16xf32>
    %cst_15 = arith.constant dense<0xFF800000> : vector<16xf32>
    %47 = vector.multi_reduction <maximumf>, %46, %cst_15 [1] : vector<16x16xf32> to vector<16xf32>
    %48 = vector.shape_cast %47 : vector<16xf32> to vector<16x1xf32>
    %49 = vector.broadcast %48 : vector<16x1xf32> to vector<16x16xf32>
    %50 = arith.subf %46, %49 : vector<16x16xf32>
    %51 = math.exp %50 : vector<16x16xf32>
    %cst_16 = arith.constant dense<0.000000e+00> : vector<16xf32>
    %52 = vector.multi_reduction <add>, %51, %cst_16 [1] : vector<16x16xf32> to vector<16xf32>
    %53 = vector.shape_cast %52 : vector<16xf32> to vector<16x1xf32>
    %54 = vector.broadcast %53 : vector<16x1xf32> to vector<16x16xf32>
    %55 = arith.divf %51, %54 : vector<16x16xf32>
    %56 = arith.truncf %55 : vector<16x16xf32> to vector<16x16xbf16>
    %57 = arith.truncf %41 : vector<16x8xf32> to vector<16x8xbf16>
    %cst_17 = arith.constant dense<0.000000e+00> : vector<16x8xf32>
    %58 = tpu.matmul %56, %57, %cst_17 {dimension_numbers = #tpu.dot_dimension_numbers<[1], [0], [0], [1], [0, 0, 1, 1], [], []>} : vector<16x16xbf16>, vector<16x8xbf16>, vector<16x8xf32> -> vector<16x8xf32>
    %59 = vector.extract_strided_slice %7 {offsets = [0, 16], sizes = [16, 8], strides = [1, 1]} : vector<16x32xf32> to vector<16x8xf32>
    %60 = vector.extract_strided_slice %8 {offsets = [0, 16], sizes = [16, 8], strides = [1, 1]} : vector<16x32xf32> to vector<16x8xf32>
    %61 = vector.extract_strided_slice %9 {offsets = [0, 16], sizes = [16, 8], strides = [1, 1]} : vector<16x32xf32> to vector<16x8xf32>
    %cst_18 = arith.constant dense<0.000000e+00> : vector<16x16xf32>
    %62 = tpu.matmul %59, %60, %cst_18 {dimension_numbers = #tpu.dot_dimension_numbers<[1], [1], [0], [0], [0, 0, 1, 0], [], []>} : vector<16x8xf32>, vector<16x8xf32>, vector<16x16xf32> -> vector<16x16xf32>
    %cst_19 = arith.constant 0.353553385 : f32
    %63 = vector.broadcast %cst_19 : f32 to vector<16x16xf32>
    %64 = arith.mulf %62, %63 : vector<16x16xf32>
    %cst_20 = arith.constant -1.000000e+30 : f32
    %65 = vector.broadcast %cst_20 : f32 to vector<16x16xf32>
    %66 = arith.select %18, %64, %65 : vector<16x16xi1>, vector<16x16xf32>
    %cst_21 = arith.constant dense<0xFF800000> : vector<16xf32>
    %67 = vector.multi_reduction <maximumf>, %66, %cst_21 [1] : vector<16x16xf32> to vector<16xf32>
    %68 = vector.shape_cast %67 : vector<16xf32> to vector<16x1xf32>
    %69 = vector.broadcast %68 : vector<16x1xf32> to vector<16x16xf32>
    %70 = arith.subf %66, %69 : vector<16x16xf32>
    %71 = math.exp %70 : vector<16x16xf32>
    %cst_22 = arith.constant dense<0.000000e+00> : vector<16xf32>
    %72 = vector.multi_reduction <add>, %71, %cst_22 [1] : vector<16x16xf32> to vector<16xf32>
    %73 = vector.shape_cast %72 : vector<16xf32> to vector<16x1xf32>
    %74 = vector.broadcast %73 : vector<16x1xf32> to vector<16x16xf32>
    %75 = arith.divf %71, %74 : vector<16x16xf32>
    %76 = arith.truncf %75 : vector<16x16xf32> to vector<16x16xbf16>
    %77 = arith.truncf %61 : vector<16x8xf32> to vector<16x8xbf16>
    %cst_23 = arith.constant dense<0.000000e+00> : vector<16x8xf32>
    %78 = tpu.matmul %76, %77, %cst_23 {dimension_numbers = #tpu.dot_dimension_numbers<[1], [0], [0], [1], [0, 0, 1, 1], [], []>} : vector<16x16xbf16>, vector<16x8xbf16>, vector<16x8xf32> -> vector<16x8xf32>
    %79 = vector.extract_strided_slice %7 {offsets = [0, 24], sizes = [16, 8], strides = [1, 1]} : vector<16x32xf32> to vector<16x8xf32>
    %80 = vector.extract_strided_slice %8 {offsets = [0, 24], sizes = [16, 8], strides = [1, 1]} : vector<16x32xf32> to vector<16x8xf32>
    %81 = vector.extract_strided_slice %9 {offsets = [0, 24], sizes = [16, 8], strides = [1, 1]} : vector<16x32xf32> to vector<16x8xf32>
    %cst_24 = arith.constant dense<0.000000e+00> : vector<16x16xf32>
    %82 = tpu.matmul %79, %80, %cst_24 {dimension_numbers = #tpu.dot_dimension_numbers<[1], [1], [0], [0], [0, 0, 1, 0], [], []>} : vector<16x8xf32>, vector<16x8xf32>, vector<16x16xf32> -> vector<16x16xf32>
    %cst_25 = arith.constant 0.353553385 : f32
    %83 = vector.broadcast %cst_25 : f32 to vector<16x16xf32>
    %84 = arith.mulf %82, %83 : vector<16x16xf32>
    %cst_26 = arith.constant -1.000000e+30 : f32
    %85 = vector.broadcast %cst_26 : f32 to vector<16x16xf32>
    %86 = arith.select %18, %84, %85 : vector<16x16xi1>, vector<16x16xf32>
    %cst_27 = arith.constant dense<0xFF800000> : vector<16xf32>
    %87 = vector.multi_reduction <maximumf>, %86, %cst_27 [1] : vector<16x16xf32> to vector<16xf32>
    %88 = vector.shape_cast %87 : vector<16xf32> to vector<16x1xf32>
    %89 = vector.broadcast %88 : vector<16x1xf32> to vector<16x16xf32>
    %90 = arith.subf %86, %89 : vector<16x16xf32>
    %91 = math.exp %90 : vector<16x16xf32>
    %cst_28 = arith.constant dense<0.000000e+00> : vector<16xf32>
    %92 = vector.multi_reduction <add>, %91, %cst_28 [1] : vector<16x16xf32> to vector<16xf32>
    %93 = vector.shape_cast %92 : vector<16xf32> to vector<16x1xf32>
    %94 = vector.broadcast %93 : vector<16x1xf32> to vector<16x16xf32>
    %95 = arith.divf %91, %94 : vector<16x16xf32>
    %96 = arith.truncf %95 : vector<16x16xf32> to vector<16x16xbf16>
    %97 = arith.truncf %81 : vector<16x8xf32> to vector<16x8xbf16>
    %cst_29 = arith.constant dense<0.000000e+00> : vector<16x8xf32>
    %98 = tpu.matmul %96, %97, %cst_29 {dimension_numbers = #tpu.dot_dimension_numbers<[1], [0], [0], [1], [0, 0, 1, 1], [], []>} : vector<16x16xbf16>, vector<16x8xbf16>, vector<16x8xf32> -> vector<16x8xf32>
    %99 = tpu.concatenate %38, %58, %78, %98 in 1 : vector<16x8xf32>, vector<16x8xf32>, vector<16x8xf32>, vector<16x8xf32> -> vector<16x32xf32>
    %100 = arith.truncf %99 : vector<16x32xf32> to vector<16x32xbf16>
    %c0_30 = arith.constant 0 : index
    %c128 = arith.constant 128 : index
    %101 = vector.load %arg1[%c0_30, %c128] : memref<64x512xbf16, #tpu.memory_space<vmem>>, vector<32x32xbf16>
    %cst_31 = arith.constant dense<0.000000e+00> : vector<16x32xf32>
    %102 = tpu.matmul %100, %101, %cst_31 {dimension_numbers = #tpu.dot_dimension_numbers<[1], [0], [0], [1], [0, 0, 1, 1], [], []>} : vector<16x32xbf16>, vector<32x32xbf16>, vector<16x32xf32> -> vector<16x32xf32>
    %c1 = arith.constant 1 : index
    %c0_32 = arith.constant 0 : index
    %103 = vector.load %arg2[%c1, %c0_32] : memref<8x128xf32, #tpu.memory_space<vmem>>, vector<1x32xf32>
    %104 = vector.broadcast %103 : vector<1x32xf32> to vector<16x32xf32>
    %105 = arith.addf %102, %104 : vector<16x32xf32>
    %106 = arith.addf %0, %105 : vector<16x32xf32>
    %c4 = arith.constant 4 : index
    %c0_33 = arith.constant 0 : index
    %107 = vector.load %arg2[%c4, %c0_33] : memref<8x128xf32, #tpu.memory_space<vmem>>, vector<1x32xf32>
    %c5 = arith.constant 5 : index
    %c0_34 = arith.constant 0 : index
    %108 = vector.load %arg2[%c5, %c0_34] : memref<8x128xf32, #tpu.memory_space<vmem>>, vector<1x32xf32>
    %cst_35 = arith.constant dense<0.000000e+00> : vector<16xf32>
    %109 = vector.multi_reduction <add>, %106, %cst_35 [1] : vector<16x32xf32> to vector<16xf32>
    %110 = vector.shape_cast %109 : vector<16xf32> to vector<16x1xf32>
    %cst_36 = arith.constant 3.200000e+01 : f32
    %111 = vector.broadcast %cst_36 : f32 to vector<16x1xf32>
    %112 = arith.divf %110, %111 : vector<16x1xf32>
    %113 = vector.broadcast %112 : vector<16x1xf32> to vector<16x32xf32>
    %114 = arith.subf %106, %113 : vector<16x32xf32>
    %115 = vector.broadcast %112 : vector<16x1xf32> to vector<16x32xf32>
    %116 = arith.subf %106, %115 : vector<16x32xf32>
    %117 = arith.mulf %114, %116 : vector<16x32xf32>
    %cst_37 = arith.constant dense<0.000000e+00> : vector<16xf32>
    %118 = vector.multi_reduction <add>, %117, %cst_37 [1] : vector<16x32xf32> to vector<16xf32>
    %119 = vector.shape_cast %118 : vector<16xf32> to vector<16x1xf32>
    %cst_38 = arith.constant 3.200000e+01 : f32
    %120 = vector.broadcast %cst_38 : f32 to vector<16x1xf32>
    %121 = arith.divf %119, %120 : vector<16x1xf32>
    %122 = vector.broadcast %112 : vector<16x1xf32> to vector<16x32xf32>
    %123 = arith.subf %106, %122 : vector<16x32xf32>
    %cst_39 = arith.constant 9.99999974E-6 : f32
    %124 = vector.broadcast %cst_39 : f32 to vector<16x1xf32>
    %125 = arith.addf %121, %124 : vector<16x1xf32>
    %126 = math.rsqrt %125 : vector<16x1xf32>
    %127 = vector.broadcast %126 : vector<16x1xf32> to vector<16x32xf32>
    %128 = arith.mulf %123, %127 : vector<16x32xf32>
    %129 = vector.broadcast %107 : vector<1x32xf32> to vector<16x32xf32>
    %130 = arith.mulf %128, %129 : vector<16x32xf32>
    %131 = vector.broadcast %108 : vector<1x32xf32> to vector<16x32xf32>
    %132 = arith.addf %130, %131 : vector<16x32xf32>
    %133 = arith.truncf %132 : vector<16x32xf32> to vector<16x32xbf16>
    %c0_40 = arith.constant 0 : index
    %c256 = arith.constant 256 : index
    %134 = vector.load %arg1[%c0_40, %c256] : memref<64x512xbf16, #tpu.memory_space<vmem>>, vector<32x64xbf16>
    %cst_41 = arith.constant dense<0.000000e+00> : vector<16x64xf32>
    %135 = tpu.matmul %133, %134, %cst_41 {dimension_numbers = #tpu.dot_dimension_numbers<[1], [0], [0], [1], [0, 0, 1, 1], [], []>} : vector<16x32xbf16>, vector<32x64xbf16>, vector<16x64xf32> -> vector<16x64xf32>
    %c2 = arith.constant 2 : index
    %c0_42 = arith.constant 0 : index
    %136 = vector.load %arg2[%c2, %c0_42] : memref<8x128xf32, #tpu.memory_space<vmem>>, vector<1x64xf32>
    %137 = vector.broadcast %136 : vector<1x64xf32> to vector<16x64xf32>
    %138 = arith.addf %135, %137 : vector<16x64xf32>
    %cst_43 = arith.constant 0.000000e+00 : f32
    %139 = vector.broadcast %cst_43 : f32 to vector<16x64xf32>
    %140 = arith.maximumf %138, %139 : vector<16x64xf32>
    %141 = arith.truncf %140 : vector<16x64xf32> to vector<16x64xbf16>
    %c0_44 = arith.constant 0 : index
    %c384 = arith.constant 384 : index
    %142 = vector.load %arg1[%c0_44, %c384] : memref<64x512xbf16, #tpu.memory_space<vmem>>, vector<64x32xbf16>
    %cst_45 = arith.constant dense<0.000000e+00> : vector<16x32xf32>
    %143 = tpu.matmul %141, %142, %cst_45 {dimension_numbers = #tpu.dot_dimension_numbers<[1], [0], [0], [1], [0, 0, 1, 1], [], []>} : vector<16x64xbf16>, vector<64x32xbf16>, vector<16x32xf32> -> vector<16x32xf32>
    %c3 = arith.constant 3 : index
    %c0_46 = arith.constant 0 : index
    %144 = vector.load %arg2[%c3, %c0_46] : memref<8x128xf32, #tpu.memory_space<vmem>>, vector<1x32xf32>
    %145 = vector.broadcast %144 : vector<1x32xf32> to vector<16x32xf32>
    %146 = arith.addf %143, %145 : vector<16x32xf32>
    %147 = arith.addf %132, %146 : vector<16x32xf32>
    %c6 = arith.constant 6 : index
    %c0_47 = arith.constant 0 : index
    %148 = vector.load %arg2[%c6, %c0_47] : memref<8x128xf32, #tpu.memory_space<vmem>>, vector<1x32xf32>
    %c7 = arith.constant 7 : index
    %c0_48 = arith.constant 0 : index
    %149 = vector.load %arg2[%c7, %c0_48] : memref<8x128xf32, #tpu.memory_space<vmem>>, vector<1x32xf32>
    %cst_49 = arith.constant dense<0.000000e+00> : vector<16xf32>
    %150 = vector.multi_reduction <add>, %147, %cst_49 [1] : vector<16x32xf32> to vector<16xf32>
    %151 = vector.shape_cast %150 : vector<16xf32> to vector<16x1xf32>
    %cst_50 = arith.constant 3.200000e+01 : f32
    %152 = vector.broadcast %cst_50 : f32 to vector<16x1xf32>
    %153 = arith.divf %151, %152 : vector<16x1xf32>
    %154 = vector.broadcast %153 : vector<16x1xf32> to vector<16x32xf32>
    %155 = arith.subf %147, %154 : vector<16x32xf32>
    %156 = vector.broadcast %153 : vector<16x1xf32> to vector<16x32xf32>
    %157 = arith.subf %147, %156 : vector<16x32xf32>
    %158 = arith.mulf %155, %157 : vector<16x32xf32>
    %cst_51 = arith.constant dense<0.000000e+00> : vector<16xf32>
    %159 = vector.multi_reduction <add>, %158, %cst_51 [1] : vector<16x32xf32> to vector<16xf32>
    %160 = vector.shape_cast %159 : vector<16xf32> to vector<16x1xf32>
    %cst_52 = arith.constant 3.200000e+01 : f32
    %161 = vector.broadcast %cst_52 : f32 to vector<16x1xf32>
    %162 = arith.divf %160, %161 : vector<16x1xf32>
    %163 = vector.broadcast %153 : vector<16x1xf32> to vector<16x32xf32>
    %164 = arith.subf %147, %163 : vector<16x32xf32>
    %cst_53 = arith.constant 9.99999974E-6 : f32
    %165 = vector.broadcast %cst_53 : f32 to vector<16x1xf32>
    %166 = arith.addf %162, %165 : vector<16x1xf32>
    %167 = math.rsqrt %166 : vector<16x1xf32>
    %168 = vector.broadcast %167 : vector<16x1xf32> to vector<16x32xf32>
    %169 = arith.mulf %164, %168 : vector<16x32xf32>
    %170 = vector.broadcast %148 : vector<1x32xf32> to vector<16x32xf32>
    %171 = arith.mulf %169, %170 : vector<16x32xf32>
    %172 = vector.broadcast %149 : vector<1x32xf32> to vector<16x32xf32>
    %173 = arith.addf %171, %172 : vector<16x32xf32>
    %c0_54 = arith.constant 0 : index
    %c0_55 = arith.constant 0 : index
    %174 = vector.load %arg3[%c0_54, %c0_55] : memref<16x32xf32, #tpu.memory_space<vmem>>, vector<16x32xf32>
    tpu.vector_store %arg3[%c0_54, %c0_55], %173 {strides = array<i32>} : memref<16x32xf32, #tpu.memory_space<vmem>>, vector<16x32xf32>,
    return
  }
}

</mosaic_0001>

<bundles_post_ra>
// kernel: tpu_custom_call.1
= control target key start
LH: loop header
LB: loop body
LE: loop exit
PB: predicated region body
PF: predicated region fallthrough
CT: control target
= control target key end

     0   :  { %8 = vsyncpa [#allocation3], 0  ;;  %s1804_s0 = inlined_call_operand.hbm [shape: f32[16,32], index: 0, kind: input, shape index: {}]   ;;  %s1805_s1 = inlined_call_operand.hbm [shape: bf16[64,512], index: 1, kind: input, shape index: {}]   ;;  %s1806_s2 = inlined_call_operand.hbm [shape: f32[8,128], index: 2, kind: input, shape index: {}]   ;;  %s1807_s3 = inlined_call_operand.hbm [shape: f32[16,32], index: 3, kind: output, shape index: {}]  }
   0x1   :  { %9 = vsyncpa [#allocation6], 0 }
   0x2   :  { %10 = vsyncpa [#allocation4], 0  ;;  %s1542_s12 = smov [#allocation5]   ;;  %s1448_s16 = scalar_lea.hbm %s1805_s1, 2048 }
   0x3   :  { %s28_s13 = sshll.u32 %s1542_s12, 4  ;;  %p1449_p0 = scmp.ne.s32.totalorder %s1805_s1, %s1448_s16  ;;  %s29_s13 = int_to_ptr.vmem [resolvable:$true] %s28_s13 }
   0x4   :  { %p1452_p1 = scmp.lt.u32.totalorder %s1448_s16, %s1805_s1 }
   0x6   :  { %p1454_p2 = pnand %p1452_p1, %p1449_p0 }
   0x8   :  { %1457 = shalt.err (!%p1454_p2)
}
   0x9   :  { %s1458_s21 = scalar_lea.vmem %s29_s13, 2048  ;;  %p1463_p4 = scmp.lt.s32.totalorder %s29_s13, %s29_s13 }
   0xa   :  { %p1459_p3 = scmp.ne.s32.totalorder %s29_s13, %s1458_s21  ;;  %p1464_p5 = scmp.lt.s32.totalorder %s1458_s21, %s1458_s21 }
   0xc   :  { %p1465_p6 = por %p1464_p5, %p1463_p4 }
   0xe   :  { %p1466_p7 = pnand %p1465_p6, %p1459_p3 }
  0x10   :  { %1469 = shalt.err (!%p1466_p7)
}
  0x11   :  { %s1543_s22 = smov 256   ;;  %s1544_s23 = smov 16  }
  0x12   :  { %34 = dma.hbm_to_vmem [thread:$0]  %s1805_s1, 2048, %s29_s13, [#allocation6], %s1543_s22, %s1543_s22, %s1544_s23  }
  0x13   :  { %s1545_s26 = smov [#allocation2]   ;;  %s1470_s30 = scalar_lea.hbm %s1804_s0, 256 }
  0x14   :  { %s16_s27 = sshll.u32 %s1545_s26, 4  ;;  %p1471_p8 = scmp.ne.s32.totalorder %s1804_s0, %s1470_s30  ;;  %s17_s27 = int_to_ptr.vmem [resolvable:$true] %s16_s27 }
  0x15   :  { %p1474_p9 = scmp.lt.u32.totalorder %s1470_s30, %s1804_s0 }
  0x17   :  { %p1476_p10 = pnand %p1474_p9, %p1471_p8 }
  0x19   :  { %1479 = shalt.err (!%p1476_p10)
}
  0x1a   :  { %s1480_s8 = scalar_lea.vmem %s17_s27, 256  ;;  %p1485_p12 = scmp.lt.s32.totalorder %s17_s27, %s17_s27 }
  0x1b   :  { %p1481_p11 = scmp.ne.s32.totalorder %s17_s27, %s1480_s8  ;;  %p1486_p13 = scmp.lt.s32.totalorder %s1480_s8, %s1480_s8 }
  0x1d   :  { %p1487_p0 = por %p1486_p13, %p1485_p12 }
  0x1f   :  { %p1488_p1 = pnand %p1487_p0, %p1481_p11 }
  0x21   :  { %1491 = shalt.err (!%p1488_p1)
}
  0x22   :  { %s1546_s1 = smov 128   ;;  %s1547_s9 = smov 8  }
  0x23   :  { %22 = dma.hbm_to_vmem [thread:$0]  %s1804_s0, 256, %s17_s27, [#allocation3], %s1546_s1, %s1546_s1, %s1547_s9  }
  0x24   :  { %s1548_s12 = smov [#allocation7]   ;;  %s1492_s16 = scalar_lea.hbm %s1806_s2, 128 }
  0x25   :  { %s41_s13 = sshll.u32 %s1548_s12, 4  ;;  %p1493_p2 = scmp.ne.s32.totalorder %s1806_s2, %s1492_s16  ;;  %s42_s13 = int_to_ptr.vmem [resolvable:$true] %s41_s13 }
  0x26   :  { %p1496_p3 = scmp.lt.u32.totalorder %s1492_s16, %s1806_s2 }
  0x28   :  { %p1498_p4 = pnand %p1496_p3, %p1493_p2 }
  0x2a   :  { %1501 = shalt.err (!%p1498_p4)
}
  0x2b   :  { %s1502_s21 = scalar_lea.vmem %s42_s13, 128  ;;  %p1507_p6 = scmp.lt.s32.totalorder %s42_s13, %s42_s13 }
  0x2c   :  { %p1503_p5 = scmp.ne.s32.totalorder %s42_s13, %s1502_s21  ;;  %p1508_p7 = scmp.lt.s32.totalorder %s1502_s21, %s1502_s21 }
  0x2e   :  { %p1509_p8 = por %p1508_p7, %p1507_p6 }
  0x30   :  { %p1510_p9 = pnand %p1509_p8, %p1503_p5 }
  0x32   :  { %1513 = shalt.err (!%p1510_p9)
}
  0x33   :  { %44 = dma.hbm_to_vmem [thread:$0]  %s1806_s2, 128, %s42_s13, [#allocation6]  }
  0x34   :  { %1536 = dma.done.wait [#allocation3], 256  }
  0x35   :  { %1537 = vsyncadd [#allocation3], 4294967040 }
  0x36   :  { %1538 = dma.done.wait [#allocation6], 2176  }
  0x37   :  { %1539 = vsyncadd [#allocation6], 4294965120  ;;  %v1549_v0 = vmov 0.0   ;;  %vm1550_vm0 = vmmov 0   ;;  %v1398_v1 = vld [vmem:[#allocation5] ss:$16 sps:$4 sm:$0xff]   ;;  %v124_v25 = vlaneseq }
  0x38   :  { %1229 = vmatprep.subr.bf16.mxu0 %v1549_v0  ;;  %1233 = vmatprep.mubr.msk.bf16.mxu0 %vm1550_vm0, %v1549_v0  ;;  %v1399_v2 = vld [vmem:[#allocation5 + $0x20] ss:$16 sps:$4 sm:$0xff]   ;;  %v1629_v4 = vld [vmem:[#allocation2 + $0x8] sm:$0xff]  ;;  %vm79_vm1 = vcmask 261120   ;;  %vm140_vm2 = vcmask 64512   ;;  %s1551_s2 = smov 120  }
  0x39   :  { %1230 = vmatpush3.bf16.msra.mxu0 %v1398_v1  ;;  %v1627_v3 = vld [vmem:[#allocation2] sm:$0xff]  ;;  %v1149_v6 = vld [vmem:[#allocation7] ss:$0 sm:$0xff]  ;;  %s1552_s24 = smov 96   ;;  %s1553_s25 = smov 88   ;;  %vm1652_vm3 = vmpackc.low %vm140_vm2, %vm140_vm2  ;;  %v125_v26 = vshrl.u32 %v124_v25, 7 }
  0x3a   :  { %1231 = vmatprep.subr.bf16.mxu0 %v1549_v0  ;;  %v57_v5 = vpack.c.bf16 %v1629_v4, %v1627_v3  ;;  %v130_v28 = vand.u32 127, %v124_v25  ;;  %vm228_vm5 = vcmask 130048   ;;  %s1554_s26 = smov 64   ;;  %s1555_s27 = smov 80   ;;  %vm824_vm7 = vcmask 195584  }
  0x3b   :  { %v126_v27 = vadd.s32 8, %v125_v26  ;;  %v127_v31 = vand.u32 1, %v125_v26  ;;  %s1556_s28 = smov 72   ;;  %s1557_s29 = smov 112   ;;  %vm1042_vm8 = vcmask 523264  }
  0x3c   :  { %v131_v30 = vand.u32 1, %v130_v28  ;;  %s1558_s30 = smov 104   ;;  %s1559_s4 = smov 56  }
  0x3d   :  { %1232 = vmatpush3.bf16.msra.mxu0 %v1399_v2  ;;  %v128_v29 = vand.u32 1, %v126_v27  ;;  %s1560_s5 = smov 48   ;;  %s1561_s6 = smov 40  }
  0x3e   :  { %vm1677_vm6 = vcmp.eq.s32.totalorder %v127_v31, %v131_v30  ;;  %s1562_s7 = smov 24  }
  0x3f   :  { %vm1673_vm4 = vcmp.eq.s32.totalorder %v128_v29, %v131_v30 }
  0x40   :  { %1234 = vmatmul.mubr.msk.bf16.vlgmr.msra.gmra.mrb[0].mxu0 %vm79_vm1, %v57_v5 }
 0x113   :  { %v117_v7 = vpop.f32.mrb[0].mxu0 }
 0x114   :  { %v1635_v8 = vadd.f32 %v1149_v6, %v117_v7  ;;  %v1235_v9 = vpop.f32.mrb[1].mxu0 }
 0x115   :  { %v120_v10 = vpop.f32.mrb[2].mxu0 }
 0x116   :  { %v1637_v11 = vadd.f32 %v1149_v6, %v120_v10  ;;  %301 = vrot.lane.b32.xlu1 %v1635_v8, %s1551_s2  ;;  %v1236_v12 = vpop.f32.mrb[3].mxu0  ;;  %1241 = vmatprep.mubr.msk.f32.mxu1 %vm140_vm2, %v1635_v8 }
 0x118   :  { %v1644_v13 = vpack.i.bf16 %v1637_v11, %v1635_v8  ;;  %v1695_v50 = vpack.c.bf16 %v1637_v11, %v1635_v8 }
 0x11a   :  { %303 = vrot.lane.b32.xlu1 %v1637_v11, %s1551_s2  ;;  %1364 = vrot.lane.b32.xlu0 %v1644_v13, %s1552_s24 }
 0x11e   :  { %1369 = vrot.lane.b32.xlu0 %v1644_v13, %s1553_s25 }
 0x188   :  { %v302_v14 = vpop.permute.xlu1 %301 }
 0x189   :  { %1254 = vmatprep.mubr.msk.f32.mxu0 %vm140_vm2, %v302_v14 }
 0x18c   :  { %v1365_v15 = vpop.permute.xlu0 %1364  ;;  %v304_v24 = vpop.permute.xlu1 %303 }
 0x18d   :  { %v1367_v16 = vunpack.i.h.bf16 %v1365_v15  ;;  %v1366_v17 = vunpack.i.l.bf16 %v1365_v15 }
 0x18f   :  { %v1317_v19 = vpack.c.bf16 %v1367_v16, %v1366_v17 }
 0x190   :  { %v1370_v20 = vpop.permute.xlu0 %1369 }
 0x191   :  { %v1372_v21 = vunpack.i.h.bf16 %v1370_v20  ;;  %v1371_v22 = vunpack.i.l.bf16 %v1370_v20  ;;  %1319 = vmatprep.subr.msk.bf16.mxu1 %vm1652_vm3, %v1317_v19 }
 0x192   :  { %1322 = vmatpush3.bf16.xpose.msk.msra.mxu1 %vm1652_vm3, %v1317_v19 }
 0x193   :  { %v1323_v23 = vpack.c.bf16 %v1372_v21, %v1371_v22  ;;  %1244 = vmatprep.subr.bf16.mxu1 %v1549_v0 }
 0x195   :  { %1325 = vmatprep.subr.msk.bf16.mxu0 %vm1652_vm3, %v1323_v23 }
 0x196   :  { %1328 = vmatpush3.bf16.xpose.msk.msra.mxu0 %vm1652_vm3, %v1323_v23 }
 0x197   :  { %1257 = vmatprep.subr.bf16.mxu0 %v1549_v0 }
 0x199   :  { %1242 = vmatmul.mubr.msk.f32.vlgmr.msra.gmra.mrb[0].mxu1 %vm140_vm2, %v1637_v11 }
 0x19a   :  { %1246 = vmatprep.mubr.msk.bf16.mxu1 %vm1550_vm0, %v1549_v0 }
 0x19d   :  { %1255 = vmatmul.mubr.msk.f32.vlgmr.msra.gmra.mrb[4].mxu0 %vm140_vm2, %v304_v24 }
 0x19e   :  { %1259 = vmatprep.mubr.msk.bf16.mxu0 %vm1550_vm0, %v1549_v0 }
 0x26c   :  { %v1243_v32 = vpop.f32.mrb[0].mxu1 }
 0x26d   :  { %v225_v34 = vmul.f32 0.35355338, %v1243_v32  ;;  %v215_v35 = vpop.f32.mrb[1].mxu1 }
 0x26e   :  { %v224_v37 = vmul.f32 0.35355338, %v215_v35 }
 0x26f   :  { %v227_v38 = vsel %vm1673_vm4, %v225_v34, -1e+30 }
 0x270   :  { %v1256_v39 = vpop.f32.mrb[4].mxu0  ;;  %v232_v40 = vsel %vm228_vm5, %v227_v38, -inf  ;;  %v226_v41 = vsel %vm1677_vm6, %v224_v37, -1e+30 }
 0x271   :  { %233 = vmax.xlane.f32.xlu1 %v232_v40  ;;  %v383_v42 = vpop.f32.mrb[5].mxu0  ;;  %v229_v43 = vsel %vm228_vm5, %v226_v41, -inf  ;;  %v393_v44 = vmul.f32 0.35355338, %v1256_v39 }
 0x272   :  { %v392_v45 = vmul.f32 0.35355338, %v383_v42  ;;  %230 = vmax.xlane.f32.xlu0 %v229_v43 }
 0x273   :  { %v395_v48 = vsel %vm1673_vm4, %v393_v44, -1e+30 }
 0x274   :  { %v394_v46 = vsel %vm1677_vm6, %v392_v45, -1e+30  ;;  %v399_v49 = vsel %vm228_vm5, %v395_v48, -inf }
 0x275   :  { %v396_v47 = vsel %vm228_vm5, %v394_v46, -inf }
 0x276   :  { %397 = vmax.xlane.f32.xlu0 %v396_v47 }
 0x27a   :  { %400 = vmax.xlane.f32.xlu0 %v399_v49 }
 0x282   :  { %254 = vrot.lane.b32.xlu1 %v1695_v50, %s1554_s26 }
 0x286   :  { %1374 = vrot.lane.b32.xlu1 %v1644_v13, %s1555_s27 }
 0x28a   :  { %1379 = vrot.lane.b32.xlu1 %v1644_v13, %s1556_s28 }
 0x2fe   :  { %v234_v51 = vpop.xlane.xlu1 %233 }
 0x2ff   :  { %v236_v52 = vsub.f32 %v227_v38, %v234_v51  ;;  %v231_v53 = vpop.xlane.xlu0 %230 }
 0x300   :  { %v235_v54 = vsub.f32 %v226_v41, %v231_v53 }
 0x301   :  { %v239_v55 = vmul.f32 1.442695, %v236_v52 }
 0x302   :  { %v237_v56 = vmul.f32 1.442695, %v235_v54  ;;  %v255_v57 = vpop.permute.xlu1 %254 }
 0x303   :  { %1408 = vpow2.f32 %v239_v55  ;;  %1245 = vmatpush3.bf16.msra.mxu1 %v255_v57  ;;  %v398_v58 = vpop.xlane.xlu0 %397 }
 0x304   :  { %1410 = vpow2.f32 %v237_v56  ;;  %v402_v59 = vsub.f32 %v394_v46, %v398_v58 }
 0x306   :  { %v404_v60 = vmul.f32 1.442695, %v402_v59  ;;  %v1375_v61 = vpop.permute.xlu1 %1374 }
 0x307   :  { %v1377_v62 = vunpack.i.h.bf16 %v1375_v61  ;;  %v1376_v63 = vunpack.i.l.bf16 %v1375_v61  ;;  %v401_v1 = vpop.xlane.xlu0 %400 }
 0x308   :  { %1412 = vpow2.f32 %v404_v60  ;;  %v403_v2 = vsub.f32 %v395_v48, %v401_v1 }
 0x309   :  { %v1329_v5 = vpack.c.bf16 %v1377_v62, %v1376_v63 }
 0x30a   :  { %v406_v6 = vmul.f32 1.442695, %v403_v2  ;;  %v1380_v17 = vpop.permute.xlu1 %1379 }
 0x30b   :  { %1331 = vmatprep.subr.msk.bf16.mxu1 %vm1652_vm3, %v1329_v5  ;;  %v1382_v22 = vunpack.i.h.bf16 %v1380_v17  ;;  %v1381_v23 = vunpack.i.l.bf16 %v1380_v17 }
 0x30c   :  { %1414 = vpow2.f32 %v406_v6 }
 0x30d   :  { %v1409_v7 = vpop.eup %1408  ;;  %v1335_v27 = vpack.c.bf16 %v1382_v22, %v1381_v23 }
 0x30e   :  { %v1411_v9 = vpop.eup %1410  ;;  %v244_v10 = vsel %vm228_vm5, %v1409_v7, 0.0 }
 0x30f   :  { %245 = vadd.xlane.f32.xlu0 %v244_v10  ;;  %v241_v12 = vsel %vm228_vm5, %v1411_v9, 0.0 }
 0x310   :  { %242 = vadd.xlane.f32.xlu1 %v241_v12 }
 0x312   :  { %v1413_v13 = vpop.eup %1412 }
 0x313   :  { %v408_v14 = vsel %vm228_vm5, %v1413_v13, 0.0 }
 0x314   :  { %409 = vadd.xlane.f32.xlu1 %v408_v14 }
 0x316   :  { %v1415_v15 = vpop.eup %1414 }
 0x317   :  { %v411_v16 = vsel %vm228_vm5, %v1415_v15, 0.0 }
 0x318   :  { %412 = vadd.xlane.f32.xlu0 %v411_v16 }
 0x325   :  { %468 = vrot.lane.b32.xlu1 %v1637_v11, %s1557_s29 }
 0x329   :  { %633 = vrot.lane.b32.xlu1 %v1637_v11, %s1558_s30 }
 0x32e   :  { %419 = vrot.lane.b32.xlu0 %v1695_v50, %s1559_s4 }
 0x332   :  { %466 = vrot.lane.b32.xlu0 %v1635_v8, %s1557_s29 }
 0x336   :  { %631 = vrot.lane.b32.xlu0 %v1635_v8, %s1558_s30 }
 0x39c   :  { %v246_v19 = vpop.xlane.xlu0 %245 }
 0x39d   :  { %1416 = vrcp.f32 %v246_v19  ;;  %v243_v20 = vpop.xlane.xlu1 %242 }
 0x39e   :  { %1418 = vrcp.f32 %v243_v20 }
 0x3a1   :  { %v410_v21 = vpop.xlane.xlu1 %409 }
 0x3a2   :  { %1420 = vrcp.f32 %v410_v21 }
 0x3a5   :  { %v413_v24 = vpop.xlane.xlu0 %412  ;;  %v469_v38 = vpop.permute.xlu1 %468 }
 0x3a6   :  { %1422 = vrcp.f32 %v413_v24 }
 0x3a7   :  { %v1417_v25 = vpop.eup %1416 }
 0x3a8   :  { %v1419_v11 = vpop.eup %1418  ;;  %v250_v26 = vmul.f32 %v1417_v25, %v1409_v7 }
 0x3a9   :  { %v248_v28 = vmul.f32 %v1419_v11, %v1411_v9  ;;  %v420_v29 = vpop.permute.xlu0 %419  ;;  %v634_v40 = vpop.permute.xlu1 %633 }
 0x3aa   :  { %1258 = vmatpush3.bf16.msra.mxu0 %v420_v29 }
 0x3ab   :  { %1337 = vmatprep.subr.msk.bf16.mxu0 %vm1652_vm3, %v1335_v27  ;;  %v251_v8 = vpack.c.bf16 %v250_v26, %v248_v28 }
 0x3ac   :  { %v1421_v31 = vpop.eup %1420 }
 0x3ad   :  { %1247 = vmatmul.mubr.msk.bf16.vlgmr.msra.gmra.mrb[4].mxu1 %vm228_vm5, %v251_v8  ;;  %v467_v30 = vpop.permute.xlu0 %466  ;;  %v415_v34 = vmul.f32 %v1421_v31, %v1413_v13 }
 0x3ae   :  { %1334 = vmatpush3.bf16.xpose.msk.msra.mxu1 %vm1652_vm3, %v1329_v5  ;;  %1267 = vmatprep.mubr.msk.f32.mxu1 %vm140_vm2, %v467_v30 }
 0x3af   :  { %1270 = vmatprep.subr.bf16.mxu1 %v1549_v0 }
 0x3b0   :  { %v1423_v32 = vpop.eup %1422 }
 0x3b1   :  { %v417_v35 = vmul.f32 %v1423_v32, %v1415_v15  ;;  %v632_v39 = vpop.permute.xlu0 %631 }
 0x3b3   :  { %v418_v37 = vpack.c.bf16 %v417_v35, %v415_v34 }
 0x3b5   :  { %1260 = vmatmul.mubr.msk.bf16.vlgmr.msra.gmra.mrb[8].mxu0 %vm228_vm5, %v418_v37  ;;  %1268 = vmatmul.mubr.msk.f32.vlgmr.msra.gmra.mrb[2].mxu1 %vm140_vm2, %v469_v38 }
 0x3b6   :  { %1340 = vmatpush3.bf16.xpose.msk.msra.mxu0 %vm1652_vm3, %v1335_v27  ;;  %1280 = vmatprep.mubr.msk.f32.mxu0 %vm140_vm2, %v632_v39 }
 0x3b7   :  { %1272 = vmatprep.mubr.msk.bf16.mxu1 %vm1550_vm0, %v1549_v0  ;;  %1283 = vmatprep.subr.bf16.mxu0 %v1549_v0 }
 0x3bd   :  { %1281 = vmatmul.mubr.msk.f32.vlgmr.msra.gmra.mrb[6].mxu0 %vm140_vm2, %v634_v40 }
 0x3be   :  { %1285 = vmatprep.mubr.msk.bf16.mxu0 %vm1550_vm0, %v1549_v0 }
 0x480   :  { %v1729_v41 = vpop.f32.mrb[4].mxu1 }
 0x481   :  { %v1248_v42 = vpop.f32.mrb[5].mxu1 }
 0x482   :  { %v1731_v43 = vpop.f32.mrb[6].mxu1  ;;  %v1400_v42 = vld [vmem:[#allocation5 + $0x4] ss:$16 sps:$4 sm:$0xff]  }
 0x483   :  { %v1249_v18 = vpop.f32.mrb[7].mxu1 }
 0x488   :  { %v459_v44 = vpop.f32.mrb[8].mxu0  ;;  %v1269_v45 = vpop.f32.mrb[2].mxu1 }
 0x489   :  { %v558_v46 = vmul.f32 0.35355338, %v1269_v45  ;;  %v1261_v47 = vpop.f32.mrb[9].mxu0  ;;  %v548_v48 = vpop.f32.mrb[3].mxu1 }
 0x48a   :  { %v557_v49 = vmul.f32 0.35355338, %v548_v48  ;;  %v462_v51 = vpop.f32.mrb[10].mxu0  ;;  %v1401_v48 = vld [vmem:[#allocation5 + $0x24] ss:$16 sps:$4 sm:$0xff]  }
 0x48b   :  { %v1383_v52 = vpack.i.bf16 %v462_v51, %v459_v44  ;;  %v1262_v53 = vpop.f32.mrb[11].mxu0  ;;  %v560_v54 = vsel %vm1673_vm4, %v558_v46, -1e+30 }
 0x48c   :  { %v564_v55 = vsel %vm228_vm5, %v560_v54, -inf  ;;  %v559_v56 = vsel %vm1677_vm6, %v557_v49, -1e+30 }
 0x48d   :  { %565 = vmax.xlane.f32.xlu1 %v564_v55  ;;  %v561_v57 = vsel %vm228_vm5, %v559_v56, -inf }
 0x48e   :  { %562 = vmax.xlane.f32.xlu0 %v561_v57 }
 0x490   :  { %v1282_v58 = vpop.f32.mrb[6].mxu0 }
 0x491   :  { %v713_v59 = vpop.f32.mrb[7].mxu0  ;;  %v723_v60 = vmul.f32 0.35355338, %v1282_v58 }
 0x492   :  { %v722_v61 = vmul.f32 0.35355338, %v713_v59 }
 0x493   :  { %v725_v1 = vsel %vm1673_vm4, %v723_v60, -1e+30 }
 0x494   :  { %v724_v62 = vsel %vm1677_vm6, %v722_v61, -1e+30  ;;  %v729_v2 = vsel %vm228_vm5, %v725_v1, -inf }
 0x495   :  { %v726_v63 = vsel %vm228_vm5, %v724_v62, -inf }
 0x496   :  { %727 = vmax.xlane.f32.xlu0 %v726_v63 }
 0x49a   :  { %730 = vmax.xlane.f32.xlu0 %v729_v2 }
 0x51a   :  { %v566_v5 = vpop.xlane.xlu1 %565 }
 0x51b   :  { %v568_v6 = vsub.f32 %v560_v54, %v566_v5  ;;  %v563_v7 = vpop.xlane.xlu0 %562 }
 0x51c   :  { %v567_v9 = vsub.f32 %v559_v56, %v563_v7 }
 0x51d   :  { %v571_v10 = vmul.f32 1.442695, %v568_v6 }
 0x51e   :  { %v569_v12 = vmul.f32 1.442695, %v567_v9 }
 0x51f   :  { %1424 = vpow2.f32 %v571_v10 }
 0x520   :  { %1426 = vpow2.f32 %v569_v12  ;;  %v1173_v12 = vld [vmem:[#allocation7 + $0x1] ss:$0 sm:$0xff] }
 0x523   :  { %v728_v13 = vpop.xlane.xlu0 %727 }
 0x524   :  { %v732_v36 = vsub.f32 %v724_v62, %v728_v13 }
 0x526   :  { %v734_v14 = vmul.f32 1.442695, %v732_v36 }
 0x527   :  { %v731_v15 = vpop.xlane.xlu0 %730 }
 0x528   :  { %1428 = vpow2.f32 %v734_v14  ;;  %v733_v16 = vsub.f32 %v725_v1, %v731_v15 }
 0x529   :  { %v1425_v17 = vpop.eup %1424 }
 0x52a   :  { %v1427_v33 = vpop.eup %1426  ;;  %v736_v19 = vmul.f32 1.442695, %v733_v16  ;;  %v576_v20 = vsel %vm228_vm5, %v1425_v17, 0.0 }
 0x52b   :  { %577 = vadd.xlane.f32.xlu0 %v576_v20  ;;  %v573_v21 = vsel %vm228_vm5, %v1427_v33, 0.0 }
 0x52c   :  { %1430 = vpow2.f32 %v736_v19  ;;  %574 = vadd.xlane.f32.xlu1 %v573_v21 }
 0x532   :  { %v1429_v22 = vpop.eup %1428 }
 0x533   :  { %v738_v23 = vsel %vm228_vm5, %v1429_v22, 0.0 }
 0x534   :  { %739 = vadd.xlane.f32.xlu1 %v738_v23 }
 0x536   :  { %v1431_v24 = vpop.eup %1430 }
 0x537   :  { %v741_v25 = vsel %vm228_vm5, %v1431_v24, 0.0 }
 0x538   :  { %742 = vadd.xlane.f32.xlu0 %v741_v25 }
 0x545   :  { %584 = vrot.lane.b32.xlu1 %v1695_v50, %s1560_s5 }
 0x549   :  { %1384 = vrot.lane.b32.xlu1 %v1383_v52, %s1547_s9 }
 0x54e   :  { %749 = vrot.lane.b32.xlu0 %v1695_v50, %s1561_s6 }
 0x5b8   :  { %v578_v11 = vpop.xlane.xlu0 %577 }
 0x5b9   :  { %1432 = vrcp.f32 %v578_v11  ;;  %v575_v26 = vpop.xlane.xlu1 %574 }
 0x5ba   :  { %1434 = vrcp.f32 %v575_v26 }
 0x5c1   :  { %v740_v27 = vpop.xlane.xlu1 %739 }
 0x5c2   :  { %1436 = vrcp.f32 %v740_v27 }
 0x5c3   :  { %v1433_v28 = vpop.eup %1432 }
 0x5c4   :  { %v1435_v29 = vpop.eup %1434  ;;  %v582_v8 = vmul.f32 %v1433_v28, %v1425_v17  ;;  %v1402_v28 = vld [vmem:[#allocation5 + $0x8] ss:$16 sps:$4 sm:$0xff]  }
 0x5c5   :  { %v580_v30 = vmul.f32 %v1435_v29, %v1427_v33  ;;  %v585_v31 = vpop.permute.xlu1 %584  ;;  %v743_v32 = vpop.xlane.xlu0 %742  ;;  %v1404_v29 = vld [vmem:[#allocation5 + $0xc] ss:$16 sps:$4 sm:$0xff]  }
 0x5c6   :  { %1438 = vrcp.f32 %v743_v32  ;;  %1271 = vmatpush3.bf16.msra.mxu1 %v585_v31 }
 0x5c7   :  { %v583_v34 = vpack.c.bf16 %v582_v8, %v580_v30  ;;  %1289 = vmatprep.subr.bf16.mxu1 %v1549_v0  ;;  %v1405_v8 = vld [vmem:[#allocation5 + $0x2c] ss:$16 sps:$4 sm:$0xff]  }
 0x5c9   :  { %1273 = vmatmul.mubr.msk.bf16.vlgmr.msra.gmra.mrb[8].mxu1 %vm228_vm5, %v583_v34  ;;  %v750_v50 = vpop.permute.xlu0 %749  ;;  %v1385_v55 = vpop.permute.xlu1 %1384 }
 0x5ca   :  { %1284 = vmatpush3.bf16.msra.mxu0 %v750_v50  ;;  %1293 = vmatprep.mubr.msk.bf16.mxu1 %vm1550_vm0, %v1549_v0  ;;  %v1387_v57 = vunpack.i.h.bf16 %v1385_v55  ;;  %v1386_v58 = vunpack.i.l.bf16 %v1385_v55 }
 0x5cb   :  { %1297 = vmatprep.subr.bf16.mxu0 %v1549_v0  ;;  %1290 = vmatpush3.bf16.msra.mxu1 %v1400_v42 }
 0x5cc   :  { %v1437_v35 = vpop.eup %1436  ;;  %1291 = vmatprep.subr.bf16.mxu1 %v1549_v0  ;;  %v821_v62 = vsel %vm140_vm2, %v1731_v43, %v1387_v57  ;;  %v820_v63 = vsel %vm140_vm2, %v1729_v41, %v1386_v58 }
 0x5cd   :  { %v745_v38 = vmul.f32 %v1437_v35, %v1429_v22 }
 0x5cf   :  { %1292 = vmatpush3.bf16.msra.mxu1 %v1401_v48 }
 0x5d0   :  { %v1439_v37 = vpop.eup %1438  ;;  %1305 = vmatprep.subr.bf16.mxu1 %v1549_v0 }
 0x5d1   :  { %v747_v39 = vmul.f32 %v1439_v37, %v1431_v24 }
 0x5d3   :  { %v748_v40 = vpack.c.bf16 %v747_v39, %v745_v38  ;;  %v1177_v38 = vld [vmem:[#allocation7 + $0x4] ss:$0 sm:$0xff] }
 0x5d5   :  { %1286 = vmatmul.mubr.msk.bf16.vlgmr.msra.gmra.mrb[12].mxu0 %vm228_vm5, %v748_v40 }
 0x5d6   :  { %1301 = vmatprep.mubr.msk.bf16.mxu0 %vm1550_vm0, %v1549_v0  ;;  %1298 = vmatpush3.bf16.msra.mxu0 %v1402_v28  ;;  %v1190_v28 = vld [vmem:[#allocation7 + $0x7] ss:$0 sm:$0xff] }
 0x5d7   :  { %1299 = vmatprep.subr.bf16.mxu0 %v1549_v0 }
 0x69c   :  { %v624_v18 = vpop.f32.mrb[8].mxu1 }
 0x69d   :  { %v1274_v44 = vpop.f32.mrb[9].mxu1 }
 0x69e   :  { %v627_v45 = vpop.f32.mrb[10].mxu1  ;;  %v1178_v44 = vld [vmem:[#allocation7 + $0x5] ss:$0 sm:$0xff] }
 0x69f   :  { %v1388_v46 = vpack.i.bf16 %v627_v45, %v624_v18  ;;  %v1275_v47 = vpop.f32.mrb[11].mxu1 }
 0x6a1   :  { %1389 = vrot.lane.b32.xlu1 %v1388_v46, %s1544_s23  ;;  %s1563_s23 = smov [#allocation8]  }
 0x6a2   :  { %s1136_s8 = sshll.u32 %s1563_s23, 4  ;;  %s1137_s8 = int_to_ptr.vmem [resolvable:$true] %s1136_s8 }
 0x6a3   :  { %s1514_s10 = scalar_lea.vmem %s1137_s8, 256  ;;  %p1519_p11 = scmp.lt.s32.totalorder %s1137_s8, %s1137_s8 }
 0x6a4   :  { %p1515_p10 = scmp.ne.s32.totalorder %s1137_s8, %s1514_s10  ;;  %p1520_p12 = scmp.lt.s32.totalorder %s1514_s10, %s1514_s10 }
 0x6a6   :  { %p1521_p13 = por %p1520_p12, %p1519_p11 }
 0x6a8   :  { %v789_v49 = vpop.f32.mrb[12].mxu0  ;;  %p1522_p0 = pnand %p1521_p13, %p1515_p10 }
 0x6a9   :  { %v1287_v51 = vpop.f32.mrb[13].mxu0 }
 0x6aa   :  { %v792_v52 = vpop.f32.mrb[14].mxu0  ;;  %v1407_v51 = vld [vmem:[#allocation5 + $0x6c] ss:$16 sps:$4 sm:$0xff]  }
 0x6ab   :  { %v1393_v53 = vpack.i.bf16 %v792_v52, %v789_v49  ;;  %v1288_v54 = vpop.f32.mrb[15].mxu0  ;;  %v1406_v49 = vld [vmem:[#allocation5 + $0x4c] ss:$16 sps:$4 sm:$0xff]   ;;  %v1179_v52 = vld [vmem:[#allocation7 + $0x2] ss:$0 sm:$0xff] }
 0x6ad   :  { %1394 = vrot.lane.b32.xlu0 %v1393_v53, %s1562_s7 }
 0x713   :  { %v1390_v56 = vpop.permute.xlu1 %1389 }
 0x714   :  { %v1392_v59 = vunpack.i.h.bf16 %v1390_v56  ;;  %v1391_v60 = vunpack.i.l.bf16 %v1390_v56 }
 0x716   :  { %v823_v5 = vsel %vm228_vm5, %v821_v62, %v1392_v59  ;;  %v822_v6 = vsel %vm228_vm5, %v820_v63, %v1391_v60  ;;  %v1183_v62 = vld [vmem:[#allocation7 + $0x3] ss:$0 sm:$0xff] }
 0x71f   :  { %v1395_v61 = vpop.permute.xlu0 %1394 }
 0x720   :  { %v1397_v1 = vunpack.i.h.bf16 %v1395_v61  ;;  %v1396_v2 = vunpack.i.l.bf16 %v1395_v61 }
 0x722   :  { %v826_v7 = vsel %vm824_vm7, %v823_v5, %v1397_v1  ;;  %v825_v9 = vsel %vm824_vm7, %v822_v6, %v1396_v2 }
 0x723   :  { %v827_v10 = vpack.c.bf16 %v826_v7, %v825_v9 }
 0x725   :  { %1294 = vmatmul.mubr.msk.bf16.vlgmr.msra.gmra.mrb[12].mxu1 %vm79_vm1, %v827_v10 }
 0x726   :  { %1313 = vmatprep.mubr.msk.bf16.mxu1 %vm1550_vm0, %v1549_v0  ;;  %1306 = vmatpush3.bf16.msra.mxu1 %v1404_v29 }
 0x727   :  { %1307 = vmatprep.subr.bf16.mxu1 %v1549_v0 }
 0x72a   :  { %1308 = vmatpush3.bf16.msra.mxu1 %v1405_v8 }
 0x72b   :  { %1309 = vmatprep.subr.bf16.mxu1 %v1549_v0 }
 0x72e   :  { %1310 = vmatpush3.bf16.msra.mxu1 %v1406_v49 }
 0x72f   :  { %1311 = vmatprep.subr.bf16.mxu1 %v1549_v0 }
 0x732   :  { %1312 = vmatpush3.bf16.msra.mxu1 %v1407_v51 }
 0x7f8   :  { %v886_v13 = vpop.f32.mrb[12].mxu1 }
 0x7f9   :  { %v887_v43 = vadd.f32 %v1173_v12, %v886_v13  ;;  %v1295_v36 = vpop.f32.mrb[13].mxu1 }
 0x7fa   :  { %v889_v14 = vpop.f32.mrb[14].mxu1 }
 0x7fb   :  { %v890_v41 = vadd.f32 %v1173_v12, %v889_v14  ;;  %v1296_v15 = vpop.f32.mrb[15].mxu1  ;;  %v893_v16 = vadd.f32 %v887_v43, %v1627_v3 }
 0x7fd   :  { %v897_v17 = vsel %vm79_vm1, %v893_v16, 0.0  ;;  %v894_v33 = vadd.f32 %v890_v41, %v1629_v4  ;;  %v1403_v4 = vld [vmem:[#allocation5 + $0x28] ss:$16 sps:$4 sm:$0xff]  }
 0x7fe   :  { %898 = vadd.xlane.f32.xlu1 %v897_v17  ;;  %1300 = vmatpush3.bf16.msra.mxu0 %v1403_v4 }
 0x7ff   :  { %v900_v19 = vsel %vm79_vm1, %v894_v33, 0.0 }
 0x800   :  { %901 = vadd.xlane.f32.xlu0 %v900_v19 }
 0x88b   :  { %v899_v20 = vpop.xlane.xlu1 %898 }
 0x88c   :  { %v904_v21 = vmul.f32 0.03125, %v899_v20 }
 0x88d   :  { %v902_v22 = vpop.xlane.xlu0 %901 }
 0x88e   :  { %v906_v23 = vsub.f32 %v893_v16, %v904_v21  ;;  %v905_v24 = vmul.f32 0.03125, %v902_v22 }
 0x890   :  { %v907_v25 = vsub.f32 %v894_v33, %v905_v24  ;;  %v908_v11 = vmul.f32 %v906_v23, %v906_v23 }
 0x892   :  { %v910_v26 = vsel %vm79_vm1, %v908_v11, 0.0  ;;  %v909_v27 = vmul.f32 %v907_v25, %v907_v25 }
 0x893   :  { %911 = vadd.xlane.f32.xlu0 %v910_v26  ;;  %v1189_v26 = vld [vmem:[#allocation7 + $0x6] ss:$0 sm:$0xff] }
 0x894   :  { %v913_v3 = vsel %vm79_vm1, %v909_v27, 0.0 }
 0x895   :  { %914 = vadd.xlane.f32.xlu1 %v913_v3 }
 0x920   :  { %v912_v30 = vpop.xlane.xlu0 %911 }
 0x921   :  { %v916_v31 = vmul.f32 0.03125, %v912_v30 }
 0x922   :  { %v915_v32 = vpop.xlane.xlu1 %914 }
 0x923   :  { %v918_v34 = vadd.f32 1e-05, %v916_v31  ;;  %v917_v50 = vmul.f32 0.03125, %v915_v32 }
 0x925   :  { %1440 = vrsqrt.f32 %v918_v34  ;;  %v919_v35 = vadd.f32 1e-05, %v917_v50 }
 0x927   :  { %1442 = vrsqrt.f32 %v919_v35 }
 0x92f   :  { %v1441_v37 = vpop.eup %1440 }
 0x930   :  { %v922_v39 = vmul.f32 %v1441_v37, %v906_v23 }
 0x931   :  { %v1443_v40 = vpop.eup %1442 }
 0x932   :  { %v928_v42 = vmul.f32 %v1177_v38, %v922_v39  ;;  %v923_v18 = vmul.f32 %v1443_v40, %v907_v25 }
 0x934   :  { %v929_v45 = vmul.f32 %v1177_v38, %v923_v18  ;;  %v934_v46 = vadd.f32 %v1178_v44, %v928_v42 }
 0x936   :  { %v935_v47 = vadd.f32 %v1178_v44, %v929_v45 }
 0x938   :  { %v936_v48 = vpack.c.bf16 %v935_v47, %v934_v46 }
 0x93a   :  { %1302 = vmatmul.mubr.msk.bf16.vlgmr.msra.gmra.mrb[16].mxu0 %vm79_vm1, %v936_v48 }
 0xa0d   :  { %v995_v53 = vpop.f32.mrb[16].mxu0 }
 0xa0e   :  { %v996_v54 = vadd.f32 %v1179_v52, %v995_v53  ;;  %v1303_v55 = vpop.f32.mrb[17].mxu0 }
 0xa0f   :  { %v998_v56 = vpop.f32.mrb[18].mxu0 }
 0xa10   :  { %v999_v57 = vadd.f32 %v1179_v52, %v998_v56  ;;  %v1304_v58 = vpop.f32.mrb[19].mxu0  ;;  %v1002_v59 = vmax.f32 %v996_v54, 0.0 }
 0xa12   :  { %v1003_v60 = vmax.f32 %v999_v57, 0.0 }
 0xa14   :  { %v1004_v61 = vpack.c.bf16 %v1003_v60, %v1002_v59 }
 0xa16   :  { %1314 = vmatmul.mubr.msk.bf16.vlgmr.msra.gmra.mrb[16].mxu1 %vm1042_vm8, %v1004_v61 }
 0xae9   :  { %v1080_v63 = vpop.f32.mrb[16].mxu1 }
 0xaea   :  { %v1081_v1 = vadd.f32 %v1183_v62, %v1080_v63  ;;  %v1315_v2 = vpop.f32.mrb[17].mxu1 }
 0xaeb   :  { %v1083_v5 = vpop.f32.mrb[18].mxu1 }
 0xaec   :  { %v1084_v0 = vadd.f32 %v1183_v62, %v1083_v5  ;;  %v1316_v6 = vpop.f32.mrb[19].mxu1  ;;  %v1087_v7 = vadd.f32 %v1081_v1, %v934_v46 }
 0xaee   :  { %v1091_v9 = vsel %vm79_vm1, %v1087_v7, 0.0  ;;  %v1088_v10 = vadd.f32 %v1084_v0, %v935_v47 }
 0xaef   :  { %1092 = vadd.xlane.f32.xlu0 %v1091_v9 }
 0xaf0   :  { %v1094_v12 = vsel %vm79_vm1, %v1088_v10, 0.0 }
 0xaf1   :  { %1095 = vadd.xlane.f32.xlu1 %v1094_v12 }
 0xb7c   :  { %v1093_v13 = vpop.xlane.xlu0 %1092 }
 0xb7d   :  { %v1097_v43 = vmul.f32 0.03125, %v1093_v13 }
 0xb7e   :  { %v1096_v36 = vpop.xlane.xlu1 %1095 }
 0xb7f   :  { %v1099_v14 = vsub.f32 %v1087_v7, %v1097_v43  ;;  %v1098_v41 = vmul.f32 0.03125, %v1096_v36 }
 0xb81   :  { %v1100_v15 = vsub.f32 %v1088_v10, %v1098_v41  ;;  %v1101_v16 = vmul.f32 %v1099_v14, %v1099_v14 }
 0xb83   :  { %v1103_v17 = vsel %vm79_vm1, %v1101_v16, 0.0  ;;  %v1102_v33 = vmul.f32 %v1100_v15, %v1100_v15 }
 0xb84   :  { %1104 = vadd.xlane.f32.xlu0 %v1103_v17 }
 0xb85   :  { %v1106_v19 = vsel %vm79_vm1, %v1102_v33, 0.0 }
 0xb86   :  { %1107 = vadd.xlane.f32.xlu1 %v1106_v19 }
 0xc11   :  { %v1105_v20 = vpop.xlane.xlu0 %1104 }
 0xc12   :  { %v1109_v21 = vmul.f32 0.03125, %v1105_v20 }
 0xc13   :  { %v1108_v22 = vpop.xlane.xlu1 %1107 }
 0xc14   :  { %v1111_v23 = vadd.f32 1e-05, %v1109_v21  ;;  %v1110_v24 = vmul.f32 0.03125, %v1108_v22 }
 0xc16   :  { %1444 = vrsqrt.f32 %v1111_v23  ;;  %v1112_v25 = vadd.f32 1e-05, %v1110_v24 }
 0xc18   :  { %1446 = vrsqrt.f32 %v1112_v25 }
 0xc20   :  { %v1445_v11 = vpop.eup %1444 }
 0xc21   :  { %v1115_v27 = vmul.f32 %v1445_v11, %v1099_v14 }
 0xc22   :  { %v1447_v3 = vpop.eup %1446 }
 0xc23   :  { %v1116_v4 = vmul.f32 %v1447_v3, %v1100_v15  ;;  %v1121_v29 = vmul.f32 %v1189_v26, %v1115_v27 }
 0xc25   :  { %v1122_v8 = vmul.f32 %v1189_v26, %v1116_v4  ;;  %v1127_v30 = vadd.f32 %v1190_v28, %v1121_v29 }
 0xc27   :  { %v1128_v31 = vadd.f32 %v1190_v28, %v1122_v8  ;;  %1129 = vst.msk [vmem:[#allocation8] sm:$0xff] %vm79_vm1, %v1127_v30 }
 0xc29   :  { %1130 = vst.msk [vmem:[#allocation8 + $0x8] sm:$0xff] %vm79_vm1, %v1128_v31 }
 0xc2a   :  { %1525 = shalt.err (!%p1522_p0)
}
 0xc2b   :  { %s1526_s13 = scalar_lea.hbm %s1807_s3, 256 }
 0xc2c   :  { %p1527_p1 = scmp.ne.s32.totalorder %s1807_s3, %s1526_s13  ;;  %p1530_p2 = scmp.lt.u32.totalorder %s1526_s13, %s1807_s3 }
 0xc2e   :  { %p1532_p3 = pnand %p1530_p2, %p1527_p1 }
 0xc30   :  { %1535 = shalt.err (!%p1532_p3)
}
 0xc31   :  { %1142 = dma.vmem_to_hbm [thread:$0]  %s1137_s8, 256, %s1807_s3, [#allocation4], %s1546_s1, %s1546_s1, %s1547_s9  }
 0xc32   :  { %1540 = dma.done.wait [#allocation4], 256  }
 0xc33   :  { %1541 = vsyncadd [#allocation4], 4294967040 }
 0xc34   :  { %1146 = vsyncpa [#allocation3], 1 }
 0xc35   :  { %1147 = vsyncpa [#allocation6], 1 }
 0xc36   :  { %1148 = vsyncpa [#allocation4], 1 }

</bundles_post_ra>
